<compile_context>
chip_gen: v6e
topology: v6e:2x2x1
jax: 0.10.0
libtpu: 0.0.40
codegen_flags: <defaults>
</compile_context>

<pallas_src>
import functools

import numpy as np
import jax
import jax.numpy as jnp
from jax.experimental import pallas as pl
from jax.experimental.pallas import tpu as pltpu

DEPTH = 2
CHANNELS = 4
KERNEL = 3
EPS = 1e-5

# The replicate-padding trick below (edge select against the unshifted value)
# is exact only for |shift| == 1, i.e. kernel // 2 == 1.
assert KERNEL == 3


def resblock_kernel(x_ref, coords_ref, w_ref, p_ref, o_ref, *, H, W):
    """All activations in lane-dense (C, N*H*W) layout.

    x_ref:      (C, NPIX)          float32 input, NPIX = N*H*W
    coords_ref: (2, NPIX)          int32, row 0 = h, row 1 = w per pixel
    w_ref:      (DEPTH*C, K*K*C)   conv weights, column order (ky, kx, cin)
    p_ref:      (C, 3*DEPTH + 2)   columns: [b0, g0, be0, b1, g1, be1, g_t, b_t]
    o_ref:      (C, NPIX)          float32 output
    """
    C, NPIX = x_ref.shape

    x = x_ref[...]

    # Edge-validity masks, hoisted and broadcast once (int32 sublane broadcast).
    hb = jnp.broadcast_to(coords_ref[0:1, :], (C, NPIX))
    wb = jnp.broadcast_to(coords_ref[1:2, :], (C, NPIX))
    masks_w = {-1: wb >= 1, 1: wb <= W - 2}   # shift along W valid?
    masks_h = {-1: hb >= 1, 1: hb <= H - 2}   # shift along H valid?

    def shift(y, d, masks, stride):
        # y[c, pix] -> y[c, pix + d*stride] with replicate clamping at the
        # H/W boundary.  For |d| == 1 the clamped value equals the unshifted
        # one, so a select against `y` at invalid positions is exact.
        if d == 0:
            return y
        rolled = pltpu.roll(y, shift=(-d * stride) % NPIX, axis=1)
        return jnp.where(masks[d], rolled, y)

    def conv(y, w_flat, bias):
        # im2col patch matrix, rows ordered (ky, kx, cin) to match w_flat.
        xs = [shift(y, dx, masks_w, 1) for dx in (-1, 0, 1)]          # W shifts
        taps = [shift(xd, dy, masks_h, W)                             # H shifts
                for dy in (-1, 0, 1) for xd in xs]                    # 9 taps
        patches = jnp.concatenate(taps, axis=0)                       # (K*K*C, NPIX)
        out = jnp.dot(w_flat, patches, preferred_element_type=jnp.float32)
        return out + bias                                             # (C, NPIX)

    def batchnorm(y, gamma, beta):
        # Training-mode BatchNorm2d: per-channel stats over N*H*W, biased var.
        inv_n = jnp.float32(1.0 / NPIX)
        s1 = jnp.sum(y, axis=1, keepdims=True)                        # lane reduce
        s2 = jnp.sum(y * y, axis=1, keepdims=True)
        mean = s1 * inv_n
        var = jnp.maximum(s2 * inv_n - mean * mean, 0.0)
        scale = gamma * jax.lax.rsqrt(var + EPS)
        return y * scale + (beta - mean * scale)

    y = x
    for i in range(DEPTH):
        w_flat = w_ref[i * C:(i + 1) * C, :]                          # (C, K*K*C)
        bias = p_ref[:, 3 * i + 0:3 * i + 1]                          # (C, 1)
        gamma = p_ref[:, 3 * i + 1:3 * i + 2]
        beta = p_ref[:, 3 * i + 2:3 * i + 3]
        y = conv(y, w_flat, bias)
        y = jnp.maximum(y, 0.0)                                       # ReLU
        y = batchnorm(y, gamma, beta)

    z = jnp.maximum(x + y, 0.0)                                       # residual + ReLU
    g_t = p_ref[:, 3 * DEPTH + 0:3 * DEPTH + 1]
    b_t = p_ref[:, 3 * DEPTH + 1:3 * DEPTH + 2]
    o_ref[...] = batchnorm(z, g_t, b_t)


@jax.jit
def resblock_forward(x_nchw, params):
    """x_nchw: (N, C, H, W) float32 (PyTorch layout).  Returns (N, C, H, W)."""
    N, C, H, W = x_nchw.shape
    NPIX = N * H * W
    KK = KERNEL * KERNEL

    # Lane-dense layout plumbing (pure layout transform, done by XLA).
    x_cp = jnp.transpose(x_nchw, (1, 0, 2, 3)).reshape(C, NPIX)

    # Per-pixel (h, w) coordinates, baked as a compile-time constant operand.
    h_idx = np.repeat(np.arange(H, dtype=np.int32), W)
    w_idx = np.tile(np.arange(W, dtype=np.int32), H)
    coords = jnp.asarray(np.stack([np.tile(h_idx, N), np.tile(w_idx, N)]))  # (2, NPIX)

    # Conv weights (Cout, Cin, KH, KW) -> (Cout, KH*KW*Cin) with column order
    # (ky, kx, cin), stacked over depth along rows.
    w_all = jnp.concatenate(
        [jnp.transpose(params[f'conv{i}_w'], (0, 2, 3, 1)).reshape(C, KK * C)
         for i in range(DEPTH)], axis=0)                              # (DEPTH*C, KK*C)

    # Per-channel vectors packed as columns of one small (C, 3*DEPTH+2) array.
    cols = []
    for i in range(DEPTH):
        cols += [params[f'conv{i}_b'], params[f'norm{i}_g'], params[f'norm{i}_b']]
    cols += [params['norm_tail_g'], params['norm_tail_b']]
    p_all = jnp.stack([c.reshape(C) for c in cols], axis=1)           # (C, 3*DEPTH+2)

    vmem = pl.BlockSpec(memory_space=pltpu.MemorySpace.VMEM)
    out_cp = pl.pallas_call(
        functools.partial(resblock_kernel, H=H, W=W),
        out_shape=jax.ShapeDtypeStruct((C, NPIX), jnp.float32),
        in_specs=[vmem, vmem, vmem, vmem],
        out_specs=vmem,
        cost_estimate=pl.CostEstimate(
            flops=int(DEPTH * 2 * C * KK * C * NPIX + 12 * C * NPIX),
            transcendentals=int((DEPTH + 1) * C),
            bytes_accessed=int(4 * (2 * C * NPIX + 2 * NPIX
                                    + w_all.size + p_all.size))),
    )(x_cp, coords, w_all, p_all)

    return jnp.transpose(out_cp.reshape(C, N, H, W), (1, 0, 2, 3))


def resblock_ref(x, params):
    """Pure-JAX (NCHW) reference for validation."""
    def conv(y, w, b):
        p = KERNEL // 2
        yp = jnp.pad(y, ((0, 0), (0, 0), (p, p), (p, p)), mode='edge')
        out = jax.lax.conv_general_dilated(
            yp, w, window_strides=(1, 1), padding='VALID',
            dimension_numbers=('NCHW', 'OIHW', 'NCHW'),
            precision=jax.lax.Precision.HIGHEST)
        return out + b.reshape(1, -1, 1, 1)

    def bn(y, g, be):
        mean = jnp.mean(y, axis=(0, 2, 3), keepdims=True)
        var = jnp.mean((y - mean) ** 2, axis=(0, 2, 3), keepdims=True)
        return ((y - mean) * jax.lax.rsqrt(var + EPS) * g.reshape(1, -1, 1, 1)
                + be.reshape(1, -1, 1, 1))

    t = x
    for i in range(DEPTH):
        t = conv(t, params[f'conv{i}_w'], params[f'conv{i}_b'])
        t = jnp.maximum(t, 0.0)
        t = bn(t, params[f'norm{i}_g'], params[f'norm{i}_b'])
    z = jnp.maximum(x + t, 0.0)
    return bn(z, params['norm_tail_g'], params['norm_tail_b'])


if __name__ == "__main__":
    N, C, H, W, K = 2, CHANNELS, 16, 16, KERNEL
    key = jax.random.PRNGKey(0)
    keys = jax.random.split(key, 4 * DEPTH + 3)

    params = {}
    ki = 0
    for i in range(DEPTH):
        params[f'conv{i}_w'] = 0.2 * jax.random.normal(keys[ki], (C, C, K, K), jnp.float32); ki += 1
        params[f'conv{i}_b'] = 0.1 * jax.random.normal(keys[ki], (C,), jnp.float32); ki += 1
        params[f'norm{i}_g'] = 1.0 + 0.1 * jax.random.normal(keys[ki], (C,), jnp.float32); ki += 1
        params[f'norm{i}_b'] = 0.1 * jax.random.normal(keys[ki], (C,), jnp.float32); ki += 1
    params['norm_tail_g'] = 1.0 + 0.1 * jax.random.normal(keys[ki], (C,), jnp.float32); ki += 1
    params['norm_tail_b'] = 0.1 * jax.random.normal(keys[ki], (C,), jnp.float32); ki += 1

    x = jax.random.normal(keys[ki], (N, C, H, W), jnp.float32)  # NCHW, like PyTorch

    out = jax.block_until_ready(resblock_forward(x, params))
    ref = jax.block_until_ready(resblock_ref(x, params))

    assert out.shape == (N, C, H, W) and out.dtype == jnp.float32
    err = float(jnp.max(jnp.abs(out - ref)))
    if err > 2e-3:
        raise SystemExit(f"mismatch vs reference: max abs err = {err:e}")
    print("KERNEL_OK")
</pallas_src>

<mosaic_0001>
module attributes {stable_mosaic.version = 11 : i64} {
  func.func @resblock_kernel(%arg0: memref<4x512xf32, #tpu.memory_space<vmem>>, %arg1: memref<2x512xi32, #tpu.memory_space<vmem>>, %arg2: memref<8x36xf32, #tpu.memory_space<vmem>>, %arg3: memref<4x8xf32, #tpu.memory_space<vmem>>, %arg4: memref<4x512xf32, #tpu.memory_space<vmem>>) attributes {dimension_semantics = [], scalar_prefetch = 0 : i64, scratch_operands = 0 : i64, tpu.core_type = #tpu.core_type<tc>} {
    %c0 = arith.constant 0 : index
    %c0_0 = arith.constant 0 : index
    %0 = vector.load %arg0[%c0, %c0_0] : memref<4x512xf32, #tpu.memory_space<vmem>>, vector<4x512xf32>
    %c0_1 = arith.constant 0 : index
    %c0_2 = arith.constant 0 : index
    %1 = vector.load %arg1[%c0_1, %c0_2] : memref<2x512xi32, #tpu.memory_space<vmem>>, vector<1x512xi32>
    %2 = vector.shape_cast %1 : vector<1x512xi32> to vector<1x512xi32>
    %3 = vector.broadcast %2 : vector<1x512xi32> to vector<4x512xi32>
    %c1 = arith.constant 1 : index
    %c0_3 = arith.constant 0 : index
    %4 = vector.load %arg1[%c1, %c0_3] : memref<2x512xi32, #tpu.memory_space<vmem>>, vector<1x512xi32>
    %5 = vector.shape_cast %4 : vector<1x512xi32> to vector<1x512xi32>
    %6 = vector.broadcast %5 : vector<1x512xi32> to vector<4x512xi32>
    %c1_i32 = arith.constant 1 : i32
    %7 = vector.broadcast %c1_i32 : i32 to vector<4x512xi32>
    %8 = arith.cmpi sge, %6, %7 : vector<4x512xi32>
    %c14_i32 = arith.constant 14 : i32
    %9 = vector.broadcast %c14_i32 : i32 to vector<4x512xi32>
    %10 = arith.cmpi sle, %6, %9 : vector<4x512xi32>
    %c1_i32_4 = arith.constant 1 : i32
    %11 = vector.broadcast %c1_i32_4 : i32 to vector<4x512xi32>
    %12 = arith.cmpi sge, %3, %11 : vector<4x512xi32>
    %c14_i32_5 = arith.constant 14 : i32
    %13 = vector.broadcast %c14_i32_5 : i32 to vector<4x512xi32>
    %14 = arith.cmpi sle, %3, %13 : vector<4x512xi32>
    %c0_6 = arith.constant 0 : index
    %c0_7 = arith.constant 0 : index
    %15 = vector.load %arg2[%c0_6, %c0_7] : memref<8x36xf32, #tpu.memory_space<vmem>>, vector<4x36xf32>
    %c0_8 = arith.constant 0 : index
    %c0_9 = arith.constant 0 : index
    %16 = vector.load %arg3[%c0_8, %c0_9] : memref<4x8xf32, #tpu.memory_space<vmem>>, vector<4x1xf32>
    %c0_10 = arith.constant 0 : index
    %c1_11 = arith.constant 1 : index
    %17 = vector.load %arg3[%c0_10, %c1_11] : memref<4x8xf32, #tpu.memory_space<vmem>>, vector<4x1xf32>
    %c0_12 = arith.constant 0 : index
    %c2 = arith.constant 2 : index
    %18 = vector.load %arg3[%c0_12, %c2] : memref<4x8xf32, #tpu.memory_space<vmem>>, vector<4x1xf32>
    %c1_i32_13 = arith.constant 1 : i32
    %19 = tpu.dynamic_rotate %0 by %c1_i32_13 dim 1 : vector<4x512xf32>, i32 -> vector<4x512xf32>
    %20 = arith.select %8, %19, %0 : vector<4x512xi1>, vector<4x512xf32>
    %c511_i32 = arith.constant 511 : i32
    %21 = tpu.dynamic_rotate %0 by %c511_i32 dim 1 : vector<4x512xf32>, i32 -> vector<4x512xf32>
    %22 = arith.select %10, %21, %0 : vector<4x512xi1>, vector<4x512xf32>
    %c16_i32 = arith.constant 16 : i32
    %23 = tpu.dynamic_rotate %20 by %c16_i32 dim 1 : vector<4x512xf32>, i32 -> vector<4x512xf32>
    %24 = arith.select %12, %23, %20 : vector<4x512xi1>, vector<4x512xf32>
    %c16_i32_14 = arith.constant 16 : i32
    %25 = tpu.dynamic_rotate %0 by %c16_i32_14 dim 1 : vector<4x512xf32>, i32 -> vector<4x512xf32>
    %26 = arith.select %12, %25, %0 : vector<4x512xi1>, vector<4x512xf32>
    %c16_i32_15 = arith.constant 16 : i32
    %27 = tpu.dynamic_rotate %22 by %c16_i32_15 dim 1 : vector<4x512xf32>, i32 -> vector<4x512xf32>
    %28 = arith.select %12, %27, %22 : vector<4x512xi1>, vector<4x512xf32>
    %c496_i32 = arith.constant 496 : i32
    %29 = tpu.dynamic_rotate %20 by %c496_i32 dim 1 : vector<4x512xf32>, i32 -> vector<4x512xf32>
    %30 = arith.select %14, %29, %20 : vector<4x512xi1>, vector<4x512xf32>
    %c496_i32_16 = arith.constant 496 : i32
    %31 = tpu.dynamic_rotate %0 by %c496_i32_16 dim 1 : vector<4x512xf32>, i32 -> vector<4x512xf32>
    %32 = arith.select %14, %31, %0 : vector<4x512xi1>, vector<4x512xf32>
    %c496_i32_17 = arith.constant 496 : i32
    %33 = tpu.dynamic_rotate %22 by %c496_i32_17 dim 1 : vector<4x512xf32>, i32 -> vector<4x512xf32>
    %34 = arith.select %14, %33, %22 : vector<4x512xi1>, vector<4x512xf32>
    %35 = tpu.concatenate %24, %26, %28, %20, %0, %22, %30, %32, %34 in 0 : vector<4x512xf32>, vector<4x512xf32>, vector<4x512xf32>, vector<4x512xf32>, vector<4x512xf32>, vector<4x512xf32>, vector<4x512xf32>, vector<4x512xf32>, vector<4x512xf32> -> vector<36x512xf32>
    %cst = arith.constant dense<0.000000e+00> : vector<4x512xf32>
    %36 = tpu.matmul %15, %35, %cst {dimension_numbers = #tpu.dot_dimension_numbers<[1], [0], [0], [1], [0, 0, 1, 1], [], []>} : vector<4x36xf32>, vector<36x512xf32>, vector<4x512xf32> -> vector<4x512xf32>
    %37 = vector.broadcast %16 : vector<4x1xf32> to vector<4x512xf32>
    %38 = arith.addf %36, %37 : vector<4x512xf32>
    %cst_18 = arith.constant 0.000000e+00 : f32
    %39 = vector.broadcast %cst_18 : f32 to vector<4x512xf32>
    %40 = arith.maximumf %38, %39 : vector<4x512xf32>
    %cst_19 = arith.constant dense<0.000000e+00> : vector<4xf32>
    %41 = vector.multi_reduction <add>, %40, %cst_19 [1] : vector<4x512xf32> to vector<4xf32>
    %42 = vector.shape_cast %41 : vector<4xf32> to vector<4x1xf32>
    %43 = arith.mulf %40, %40 : vector<4x512xf32>
    %cst_20 = arith.constant dense<0.000000e+00> : vector<4xf32>
    %44 = vector.multi_reduction <add>, %43, %cst_20 [1] : vector<4x512xf32> to vector<4xf32>
    %45 = vector.shape_cast %44 : vector<4xf32> to vector<4x1xf32>
    %cst_21 = arith.constant 0.001953125 : f32
    %46 = vector.broadcast %cst_21 : f32 to vector<4x1xf32>
    %47 = arith.mulf %42, %46 : vector<4x1xf32>
    %cst_22 = arith.constant 0.001953125 : f32
    %48 = vector.broadcast %cst_22 : f32 to vector<4x1xf32>
    %49 = arith.mulf %45, %48 : vector<4x1xf32>
    %50 = arith.mulf %47, %47 : vector<4x1xf32>
    %51 = arith.subf %49, %50 : vector<4x1xf32>
    %cst_23 = arith.constant 0.000000e+00 : f32
    %52 = vector.broadcast %cst_23 : f32 to vector<4x1xf32>
    %53 = arith.maximumf %51, %52 : vector<4x1xf32>
    %cst_24 = arith.constant 9.99999974E-6 : f32
    %54 = vector.broadcast %cst_24 : f32 to vector<4x1xf32>
    %55 = arith.addf %53, %54 : vector<4x1xf32>
    %56 = math.rsqrt %55 : vector<4x1xf32>
    %57 = arith.mulf %17, %56 : vector<4x1xf32>
    %58 = vector.broadcast %57 : vector<4x1xf32> to vector<4x512xf32>
    %59 = arith.mulf %40, %58 : vector<4x512xf32>
    %60 = arith.mulf %47, %57 : vector<4x1xf32>
    %61 = arith.subf %18, %60 : vector<4x1xf32>
    %62 = vector.broadcast %61 : vector<4x1xf32> to vector<4x512xf32>
    %63 = arith.addf %59, %62 : vector<4x512xf32>
    %c4 = arith.constant 4 : index
    %c0_25 = arith.constant 0 : index
    %64 = vector.load %arg2[%c4, %c0_25] : memref<8x36xf32, #tpu.memory_space<vmem>>, vector<4x36xf32>
    %c0_26 = arith.constant 0 : index
    %c3 = arith.constant 3 : index
    %65 = vector.load %arg3[%c0_26, %c3] : memref<4x8xf32, #tpu.memory_space<vmem>>, vector<4x1xf32>
    %c0_27 = arith.constant 0 : index
    %c4_28 = arith.constant 4 : index
    %66 = vector.load %arg3[%c0_27, %c4_28] : memref<4x8xf32, #tpu.memory_space<vmem>>, vector<4x1xf32>
    %c0_29 = arith.constant 0 : index
    %c5 = arith.constant 5 : index
    %67 = vector.load %arg3[%c0_29, %c5] : memref<4x8xf32, #tpu.memory_space<vmem>>, vector<4x1xf32>
    %c1_i32_30 = arith.constant 1 : i32
    %68 = tpu.dynamic_rotate %63 by %c1_i32_30 dim 1 : vector<4x512xf32>, i32 -> vector<4x512xf32>
    %69 = arith.select %8, %68, %63 : vector<4x512xi1>, vector<4x512xf32>
    %c511_i32_31 = arith.constant 511 : i32
    %70 = tpu.dynamic_rotate %63 by %c511_i32_31 dim 1 : vector<4x512xf32>, i32 -> vector<4x512xf32>
    %71 = arith.select %10, %70, %63 : vector<4x512xi1>, vector<4x512xf32>
    %c16_i32_32 = arith.constant 16 : i32
    %72 = tpu.dynamic_rotate %69 by %c16_i32_32 dim 1 : vector<4x512xf32>, i32 -> vector<4x512xf32>
    %73 = arith.select %12, %72, %69 : vector<4x512xi1>, vector<4x512xf32>
    %c16_i32_33 = arith.constant 16 : i32
    %74 = tpu.dynamic_rotate %63 by %c16_i32_33 dim 1 : vector<4x512xf32>, i32 -> vector<4x512xf32>
    %75 = arith.select %12, %74, %63 : vector<4x512xi1>, vector<4x512xf32>
    %c16_i32_34 = arith.constant 16 : i32
    %76 = tpu.dynamic_rotate %71 by %c16_i32_34 dim 1 : vector<4x512xf32>, i32 -> vector<4x512xf32>
    %77 = arith.select %12, %76, %71 : vector<4x512xi1>, vector<4x512xf32>
    %c496_i32_35 = arith.constant 496 : i32
    %78 = tpu.dynamic_rotate %69 by %c496_i32_35 dim 1 : vector<4x512xf32>, i32 -> vector<4x512xf32>
    %79 = arith.select %14, %78, %69 : vector<4x512xi1>, vector<4x512xf32>
    %c496_i32_36 = arith.constant 496 : i32
    %80 = tpu.dynamic_rotate %63 by %c496_i32_36 dim 1 : vector<4x512xf32>, i32 -> vector<4x512xf32>
    %81 = arith.select %14, %80, %63 : vector<4x512xi1>, vector<4x512xf32>
    %c496_i32_37 = arith.constant 496 : i32
    %82 = tpu.dynamic_rotate %71 by %c496_i32_37 dim 1 : vector<4x512xf32>, i32 -> vector<4x512xf32>
    %83 = arith.select %14, %82, %71 : vector<4x512xi1>, vector<4x512xf32>
    %84 = tpu.concatenate %73, %75, %77, %69, %63, %71, %79, %81, %83 in 0 : vector<4x512xf32>, vector<4x512xf32>, vector<4x512xf32>, vector<4x512xf32>, vector<4x512xf32>, vector<4x512xf32>, vector<4x512xf32>, vector<4x512xf32>, vector<4x512xf32> -> vector<36x512xf32>
    %cst_38 = arith.constant dense<0.000000e+00> : vector<4x512xf32>
    %85 = tpu.matmul %64, %84, %cst_38 {dimension_numbers = #tpu.dot_dimension_numbers<[1], [0], [0], [1], [0, 0, 1, 1], [], []>} : vector<4x36xf32>, vector<36x512xf32>, vector<4x512xf32> -> vector<4x512xf32>
    %86 = vector.broadcast %65 : vector<4x1xf32> to vector<4x512xf32>
    %87 = arith.addf %85, %86 : vector<4x512xf32>
    %cst_39 = arith.constant 0.000000e+00 : f32
    %88 = vector.broadcast %cst_39 : f32 to vector<4x512xf32>
    %89 = arith.maximumf %87, %88 : vector<4x512xf32>
    %cst_40 = arith.constant dense<0.000000e+00> : vector<4xf32>
    %90 = vector.multi_reduction <add>, %89, %cst_40 [1] : vector<4x512xf32> to vector<4xf32>
    %91 = vector.shape_cast %90 : vector<4xf32> to vector<4x1xf32>
    %92 = arith.mulf %89, %89 : vector<4x512xf32>
    %cst_41 = arith.constant dense<0.000000e+00> : vector<4xf32>
    %93 = vector.multi_reduction <add>, %92, %cst_41 [1] : vector<4x512xf32> to vector<4xf32>
    %94 = vector.shape_cast %93 : vector<4xf32> to vector<4x1xf32>
    %cst_42 = arith.constant 0.001953125 : f32
    %95 = vector.broadcast %cst_42 : f32 to vector<4x1xf32>
    %96 = arith.mulf %91, %95 : vector<4x1xf32>
    %cst_43 = arith.constant 0.001953125 : f32
    %97 = vector.broadcast %cst_43 : f32 to vector<4x1xf32>
    %98 = arith.mulf %94, %97 : vector<4x1xf32>
    %99 = arith.mulf %96, %96 : vector<4x1xf32>
    %100 = arith.subf %98, %99 : vector<4x1xf32>
    %cst_44 = arith.constant 0.000000e+00 : f32
    %101 = vector.broadcast %cst_44 : f32 to vector<4x1xf32>
    %102 = arith.maximumf %100, %101 : vector<4x1xf32>
    %cst_45 = arith.constant 9.99999974E-6 : f32
    %103 = vector.broadcast %cst_45 : f32 to vector<4x1xf32>
    %104 = arith.addf %102, %103 : vector<4x1xf32>
    %105 = math.rsqrt %104 : vector<4x1xf32>
    %106 = arith.mulf %66, %105 : vector<4x1xf32>
    %107 = vector.broadcast %106 : vector<4x1xf32> to vector<4x512xf32>
    %108 = arith.mulf %89, %107 : vector<4x512xf32>
    %109 = arith.mulf %96, %106 : vector<4x1xf32>
    %110 = arith.subf %67, %109 : vector<4x1xf32>
    %111 = vector.broadcast %110 : vector<4x1xf32> to vector<4x512xf32>
    %112 = arith.addf %108, %111 : vector<4x512xf32>
    %113 = arith.addf %0, %112 : vector<4x512xf32>
    %cst_46 = arith.constant 0.000000e+00 : f32
    %114 = vector.broadcast %cst_46 : f32 to vector<4x512xf32>
    %115 = arith.maximumf %113, %114 : vector<4x512xf32>
    %c0_47 = arith.constant 0 : index
    %c6 = arith.constant 6 : index
    %116 = vector.load %arg3[%c0_47, %c6] : memref<4x8xf32, #tpu.memory_space<vmem>>, vector<4x1xf32>
    %c0_48 = arith.constant 0 : index
    %c7 = arith.constant 7 : index
    %117 = vector.load %arg3[%c0_48, %c7] : memref<4x8xf32, #tpu.memory_space<vmem>>, vector<4x1xf32>
    %cst_49 = arith.constant dense<0.000000e+00> : vector<4xf32>
    %118 = vector.multi_reduction <add>, %115, %cst_49 [1] : vector<4x512xf32> to vector<4xf32>
    %119 = vector.shape_cast %118 : vector<4xf32> to vector<4x1xf32>
    %120 = arith.mulf %115, %115 : vector<4x512xf32>
    %cst_50 = arith.constant dense<0.000000e+00> : vector<4xf32>
    %121 = vector.multi_reduction <add>, %120, %cst_50 [1] : vector<4x512xf32> to vector<4xf32>
    %122 = vector.shape_cast %121 : vector<4xf32> to vector<4x1xf32>
    %cst_51 = arith.constant 0.001953125 : f32
    %123 = vector.broadcast %cst_51 : f32 to vector<4x1xf32>
    %124 = arith.mulf %119, %123 : vector<4x1xf32>
    %cst_52 = arith.constant 0.001953125 : f32
    %125 = vector.broadcast %cst_52 : f32 to vector<4x1xf32>
    %126 = arith.mulf %122, %125 : vector<4x1xf32>
    %127 = arith.mulf %124, %124 : vector<4x1xf32>
    %128 = arith.subf %126, %127 : vector<4x1xf32>
    %cst_53 = arith.constant 0.000000e+00 : f32
    %129 = vector.broadcast %cst_53 : f32 to vector<4x1xf32>
    %130 = arith.maximumf %128, %129 : vector<4x1xf32>
    %cst_54 = arith.constant 9.99999974E-6 : f32
    %131 = vector.broadcast %cst_54 : f32 to vector<4x1xf32>
    %132 = arith.addf %130, %131 : vector<4x1xf32>
    %133 = math.rsqrt %132 : vector<4x1xf32>
    %134 = arith.mulf %116, %133 : vector<4x1xf32>
    %135 = vector.broadcast %134 : vector<4x1xf32> to vector<4x512xf32>
    %136 = arith.mulf %115, %135 : vector<4x512xf32>
    %137 = arith.mulf %124, %134 : vector<4x1xf32>
    %138 = arith.subf %117, %137 : vector<4x1xf32>
    %139 = vector.broadcast %138 : vector<4x1xf32> to vector<4x512xf32>
    %140 = arith.addf %136, %139 : vector<4x512xf32>
    %c0_55 = arith.constant 0 : index
    %c0_56 = arith.constant 0 : index
    %141 = vector.load %arg4[%c0_55, %c0_56] : memref<4x512xf32, #tpu.memory_space<vmem>>, vector<4x512xf32>
    tpu.vector_store %arg4[%c0_55, %c0_56], %140 {strides = array<i32>} : memref<4x512xf32, #tpu.memory_space<vmem>>, vector<4x512xf32>,
    return
  }
}

</mosaic_0001>

<bundles_post_ra>
// kernel: resblock_forward.1
= control target key start
LH: loop header
LB: loop body
LE: loop exit
PB: predicated region body
PF: predicated region fallthrough
CT: control target
= control target key end

     0   :  { %v20_v0 = vlaneseq  ;;  %s1051_s19 = smov 127   ;;  %s1052_s20 = smov 1   ;;  %v1055_v45 = vmov 0.0   ;;  %v1056_v46 = vmov 0   ;;  %vm260_vm12 = vcmask 1043456   ;;  %s1815_s0 = inlined_call_operand.vmem [shape: f32[4,512], index: 0, kind: input, shape index: {}]   ;;  %s1816_s1 = inlined_call_operand.vmem [shape: s32[2,512], index: 1, kind: input, shape index: {}]   ;;  %s1817_s3 = inlined_call_operand.vmem [shape: f32[4,8], index: 3, kind: input, shape index: {}]   ;;  %s1818_s2 = inlined_call_operand.vmem [shape: f32[8,36], index: 2, kind: input, shape index: {}]   ;;  %s1819_s4 = inlined_call_operand.vmem [shape: f32[4,512], index: 4, kind: output, shape index: {}]  }
   0x1   :  { %v1093_v1 = vld [vmem:[%s1815_s0 + $0x8] sm:$0xff]  ;;  %v1098_v2 = vld [vmem:[%s1815_s0] sm:$0xff]  ;;  %s1053_s23 = smov 112   ;;  %s1054_s24 = smov 16   ;;  %362 = vmatprep.mubr.f32.mxu0 %v1055_v45  ;;  %433 = vmatprep.mubr.f32.mxu1 %v1055_v45 }
   0x2   :  { %101 = vrot.lane.b32.xlu0 %v1093_v1, %s1051_s19  ;;  %78 = vrot.lane.b32.xlu1 %v1098_v2, %s1052_s20  ;;  %v1106_v3 = vcombine.high %v1093_v1, %v1093_v1  ;;  %v1110_v4 = vcombine.high %v1098_v2, %v1098_v2  ;;  %v1112_v5 = vshrl.u32 %v20_v0, 7  ;;  %v19_v6 = vld [vmem:[%s1816_s1] ss:$2 sm:$0xf]  ;;  %v1160_v16 = vand.u32 127, %v20_v0 }
   0x3   :  { %v1005_v15 = vld [vmem:[%s1816_s1 + $0x1] ss:$2 sm:$0xf]  ;;  %1032 = vset.pattern.permute.xlu0 %v1056_v46 }
   0x4   :  { %v30_v7 = vsub.s32 2, %v1112_v5  ;;  %v26_v8 = vsub.s32 1, %v1112_v5  ;;  %v22_v9 = vsub.s32 0, %v1112_v5  ;;  %v34_v10 = vsub.s32 3, %v1112_v5  ;;  %v1273_v47 = vld [vmem:[%s1817_s3] sm:$0xf] }
   0x5   :  { %vm105_vm0 = vcmp.lt.s32.totalorder %v1160_v16, 127  ;;  %vm88_vm3 = vcmp.lt.s32.totalorder %v1160_v16, 1  ;;  %vm1825_vm10 = vcmp.lt.s32.totalorder %v1160_v16, 112 }
   0x6   :  { %103 = vrot.lane.b32.xlu1 %v1106_v3, %s1051_s19  ;;  %99 = vrot.lane.b32.xlu0 %v1110_v4, %s1051_s19  ;;  %v1125_v11 = vrot.slane %v19_v6, %v30_v7  ;;  %v1127_v12 = vrot.slane %v19_v6, %v26_v8  ;;  %v1129_v13 = vrot.slane %v19_v6, %v22_v9 }
   0x7   :  { %v1131_v14 = vrot.slane %v19_v6, %v34_v10  ;;  %v1162_v17 = vrot.slane %v1005_v15, %v30_v7  ;;  %v1164_v18 = vrot.slane %v1005_v15, %v26_v8  ;;  %v1190_v27 = vrot.slane %v1005_v15, %v22_v9 }
   0x8   :  { %v1210_v34 = vrot.slane %v1005_v15, %v34_v10  ;;  %vm1821_vm11 = vcmp.le.s32.totalorder %v1127_v12, 14  ;;  %vm1820_vm13 = vcmp.le.s32.totalorder %v1129_v13, 14  ;;  %vm1824_vm14 = vcmp.le.s32.totalorder %v1125_v11, 14 }
   0x9   :  { %vm60_vm1 = vcmp.le.s32.totalorder %v1162_v17, 14  ;;  %vm59_vm2 = vcmp.le.s32.totalorder %v1164_v18, 14  ;;  %vm55_vm4 = vcmp.ge.s32.totalorder %v1164_v18, 1  ;;  %vm56_vm5 = vcmp.ge.s32.totalorder %v1162_v17, 1 }
   0xa   :  { %82 = vrot.lane.b32.xlu1 %v1093_v1, %s1052_s20  ;;  %80 = vrot.lane.b32.xlu0 %v1110_v4, %s1052_s20  ;;  %vm54_vm6 = vcmp.ge.s32.totalorder %v1190_v27, 1  ;;  %vm58_vm7 = vcmp.le.s32.totalorder %v1190_v27, 14  ;;  %vm61_vm8 = vcmp.le.s32.totalorder %v1210_v34, 14  ;;  %vm1822_vm9 = vcmp.ge.s32.totalorder %v1210_v34, 1 }
   0xb   :  { %vm1823_vm15 = vcmp.le.s32.totalorder %v1131_v14, 14 }
   0xe   :  { %84 = vrot.lane.b32.xlu1 %v1106_v3, %s1052_s20  ;;  %97 = vrot.lane.b32.xlu0 %v1098_v2, %s1051_s19 }
  0x12   :  { %184 = vrot.lane.b32.xlu1 %v1093_v1, %s1053_s23  ;;  %182 = vrot.lane.b32.xlu0 %v1110_v4, %s1053_s23 }
  0x16   :  { %186 = vrot.lane.b32.xlu1 %v1106_v3, %s1053_s23  ;;  %180 = vrot.lane.b32.xlu0 %v1098_v2, %s1053_s23 }
  0x1a   :  { %131 = vrot.lane.b32.xlu1 %v1098_v2, %s1054_s24  ;;  %133 = vrot.lane.b32.xlu0 %v1110_v4, %s1054_s24 }
  0x1e   :  { %135 = vrot.lane.b32.xlu1 %v1093_v1, %s1054_s24  ;;  %137 = vrot.lane.b32.xlu0 %v1106_v3, %s1054_s24 }
  0x74   :  { %v102_v19 = vpop.permute.xlu0 %101  ;;  %v79_v20 = vpop.permute.xlu1 %78 }
  0x78   :  { %v104_v21 = vpop.permute.xlu1 %103  ;;  %v100_v22 = vpop.permute.xlu0 %99 }
  0x79   :  { %v106_v23 = vsel %vm105_vm0, %v102_v19, %v104_v21  ;;  %v107_v24 = vsel %vm105_vm0, %v100_v22, %v102_v19 }
  0x7a   :  { %v1176_v25 = vsel %vm60_vm1, %v106_v23, %v1093_v1  ;;  %v1181_v26 = vsel %vm59_vm2, %v107_v24, %v1110_v4 }
  0x7b   :  { %200 = vrot.lane.b32.xlu0 %v1176_v25, %s1053_s23  ;;  %198 = vrot.lane.b32.xlu1 %v1181_v26, %s1053_s23  ;;  %v241_v15 = vrot.slane %v1181_v26, 4 }
  0x7c   :  { %v83_v28 = vpop.permute.xlu1 %82  ;;  %v81_v29 = vpop.permute.xlu0 %80 }
  0x7d   :  { %v90_v30 = vsel %vm88_vm3, %v81_v29, %v83_v28  ;;  %v91_v31 = vsel %vm88_vm3, %v79_v20, %v81_v29  ;;  %v270_v46 = vsel %vm260_vm12, %v1110_v4, %v241_v15 }
  0x7e   :  { %v1199_v32 = vsel %vm55_vm4, %v91_v31, %v1110_v4  ;;  %v1204_v33 = vsel %vm56_vm5, %v90_v30, %v1093_v1 }
  0x7f   :  { %165 = vrot.lane.b32.xlu1 %v1199_v32, %s1053_s23  ;;  %167 = vrot.lane.b32.xlu0 %v1204_v33, %s1053_s23 }
  0x80   :  { %v85_v35 = vpop.permute.xlu1 %84  ;;  %v98_v36 = vpop.permute.xlu0 %97 }
  0x81   :  { %v92_v37 = vsel %vm88_vm3, %v85_v35, %v79_v20  ;;  %v108_v38 = vsel %vm105_vm0, %v98_v36, %v100_v22  ;;  %v109_v41 = vsel %vm105_vm0, %v104_v21, %v98_v36  ;;  %v89_v43 = vsel %vm88_vm3, %v83_v28, %v85_v35 }
  0x82   :  { %v1221_v39 = vsel %vm54_vm6, %v92_v37, %v1098_v2  ;;  %v1226_v40 = vsel %vm58_vm7, %v108_v38, %v1098_v2  ;;  %v1238_v42 = vsel %vm61_vm8, %v109_v41, %v1106_v3  ;;  %v1250_v44 = vsel %vm1822_vm9, %v89_v43, %v1106_v3 }
  0x83   :  { %163 = vrot.lane.b32.xlu0 %v1221_v39, %s1053_s23  ;;  %196 = vrot.lane.b32.xlu1 %v1226_v40, %s1053_s23  ;;  %v240_v29 = vrot.slane %v1226_v40, 4  ;;  %vm62_vm9 = vcmp.ge.s32.totalorder %v1129_v13, 1 }
  0x84   :  { %v185_v48 = vpop.permute.xlu1 %184  ;;  %v183_v49 = vpop.permute.xlu0 %182 }
  0x85   :  { %v189_v60 = vsel %vm1825_vm10, %v183_v49, %v185_v48 }
  0x86   :  { %v193_v6 = vsel %vm1821_vm11, %v189_v60, %v1110_v4  ;;  %v243_v60 = vrot.slane %v1238_v42, 4 }
  0x87   :  { %202 = vrot.lane.b32.xlu0 %v1238_v42, %s1053_s23  ;;  %147 = vrot.lane.b32.xlu1 %v1226_v40, %s1054_s24  ;;  %v253_v19 = vrot.slane %v193_v6, 4 }
  0x88   :  { %v187_v50 = vpop.permute.xlu1 %186  ;;  %v181_v51 = vpop.permute.xlu0 %180 }
  0x89   :  { %v190_v61 = vsel %vm1825_vm10, %v181_v51, %v183_v49  ;;  %v188_v23 = vsel %vm1825_vm10, %v185_v48, %v187_v50  ;;  %v191_v30 = vsel %vm1825_vm10, %v187_v50, %v181_v51  ;;  %v269_v49 = vsel %vm260_vm12, %v1098_v2, %v240_v29 }
  0x8a   :  { %v192_v7 = vsel %vm1820_vm13, %v190_v61, %v1098_v2  ;;  %v194_v38 = vsel %vm1824_vm14, %v188_v23, %v1093_v1  ;;  %v195_v48 = vsel %vm1823_vm15, %v191_v30, %v1106_v3  ;;  %v242_v61 = vrot.slane %v1176_v25, 4 }
  0x8b   :  { %149 = vrot.lane.b32.xlu0 %v1181_v26, %s1054_s24  ;;  %169 = vrot.lane.b32.xlu1 %v1250_v44, %s1053_s23  ;;  %v252_v20 = vrot.slane %v192_v7, 4 }
  0x8c   :  { %v1276_v52 = vpop.permute.xlu1 %131  ;;  %v1278_v53 = vpop.permute.xlu0 %133  ;;  %v271_v30 = vsel %vm260_vm12, %v1093_v1, %v242_v61 }
  0x8f   :  { %114 = vrot.lane.b32.xlu0 %v1221_v39, %s1054_s24  ;;  %153 = vrot.lane.b32.xlu1 %v1238_v42, %s1054_s24 }
  0x90   :  { %v1280_v54 = vpop.permute.xlu1 %135  ;;  %v1282_v55 = vpop.permute.xlu0 %137 }
  0x93   :  { %120 = vrot.lane.b32.xlu0 %v1250_v44, %s1054_s24  ;;  %116 = vrot.lane.b32.xlu1 %v1199_v32, %s1054_s24 }
  0x97   :  { %151 = vrot.lane.b32.xlu0 %v1176_v25, %s1054_s24  ;;  %118 = vrot.lane.b32.xlu1 %v1204_v33, %s1054_s24 }
  0x9b   :  { %279 = vperm.xlu0 %1032, %v1273_v47  }
  0xed   :  { %v199_v56 = vpop.permute.xlu1 %198  ;;  %v201_v57 = vpop.permute.xlu0 %200 }
  0xee   :  { %v205_v58 = vsel %vm1825_vm10, %v199_v56, %v201_v57 }
  0xef   :  { %v209_v59 = vsel %vm1821_vm11, %v205_v58, %v1181_v26 }
  0xf0   :  { %1006 = vmatprep.subr.msk.mxu0 %vm260_vm12, %v209_v59  ;;  %v229_v59 = vrot.slane %v1199_v32, 4 }
  0xf1   :  { %v166_v62 = vpop.permute.xlu1 %165  ;;  %v168_v63 = vpop.permute.xlu0 %167 }
  0xf2   :  { %v173_v0 = vsel %vm1825_vm10, %v166_v62, %v168_v63 }
  0xf3   :  { %v177_v10 = vsel %vm1821_vm11, %v173_v0, %v1199_v32  ;;  %vm63_vm11 = vcmp.ge.s32.totalorder %v1127_v12, 1 }
  0xf4   :  { %v274_v31 = vsel %vm260_vm12, %v177_v10, %v253_v19 }
  0xf5   :  { %v197_v8 = vpop.permute.xlu1 %196  ;;  %v164_v9 = vpop.permute.xlu0 %163 }
  0xf6   :  { %v206_v21 = vsel %vm1825_vm10, %v197_v8, %v199_v56  ;;  %v174_v22 = vsel %vm1825_vm10, %v164_v9, %v166_v62  ;;  %v254_v56 = vrot.slane %v194_v38, 4  ;;  %v255_v62 = vrot.slane %v195_v48, 4 }
  0xf7   :  { %v208_v24 = vsel %vm1820_vm13, %v206_v21, %v1226_v40  ;;  %v176_v28 = vsel %vm1820_vm13, %v174_v22, %v1221_v39  ;;  %vm122_vm13 = vcmp.lt.s32.totalorder %v1160_v16, 16 }
  0xf8   :  { %1007 = vmatpush1.msk.msra.mxu0 %vm260_vm12, %v208_v24  ;;  %v273_v35 = vsel %vm260_vm12, %v176_v28, %v252_v20  ;;  %v228_v28 = vrot.slane %v1221_v39, 4 }
  0xf9   :  { %v148_v36 = vpop.permute.xlu1 %147  ;;  %322 = vmatprep.subr.mxu0 %v274_v31  ;;  %v203_v37 = vpop.permute.xlu0 %202 }
  0xfa   :  { %v204_v41 = vsel %vm1825_vm10, %v201_v57, %v203_v37  ;;  %v207_v43 = vsel %vm1825_vm10, %v203_v37, %v197_v8  ;;  %323 = vmatpush1.msra.mxu0 %v273_v35  ;;  %v141_v8 = vsel %vm122_vm13, %v1276_v52, %v1278_v53 }
  0xfb   :  { %324 = vmatprep.subr.mxu0 %v270_v46  ;;  %v211_v50 = vsel %vm1823_vm15, %v207_v43, %v1238_v42  ;;  %v210_v51 = vsel %vm1824_vm14, %v204_v41, %v1176_v25  ;;  %v144_v23 = vsel %vm63_vm11, %v141_v8, %v1110_v4 }
  0xfc   :  { %325 = vmatpush1.msra.mxu0 %v269_v49  ;;  %1009 = vmatprep.subr.msk.mxu1 %vm260_vm12, %v211_v50  ;;  %v217_v35 = vrot.slane %v144_v23, 4 }
  0xfd   :  { %v170_v57 = vpop.permute.xlu1 %169  ;;  %1010 = vmatpush1.msk.msra.mxu1 %vm260_vm12, %v210_v51  ;;  %v150_v58 = vpop.permute.xlu0 %149  ;;  %v231_v51 = vrot.slane %v1250_v44, 4 }
  0xfe   :  { %v172_v0 = vsel %vm1825_vm10, %v168_v63, %v170_v57  ;;  %v175_v6 = vsel %vm1825_vm10, %v170_v57, %v164_v9  ;;  %v157_v7 = vsel %vm122_vm13, %v148_v36, %v150_v58  ;;  %v142_v9 = vsel %vm122_vm13, %v1282_v55, %v1276_v52 }
  0xff   :  { %v160_v10 = vsel %vm63_vm11, %v157_v7, %v1181_v26  ;;  %v179_v15 = vsel %vm1823_vm15, %v175_v6, %v1250_v44  ;;  %v178_v63 = vsel %vm1824_vm14, %v172_v0, %v1204_v33  ;;  %v272_v52 = vsel %vm260_vm12, %v1106_v3, %v243_v60 }
 0x100   :  { %v266_v19 = vsel %vm260_vm12, %v160_v10, %v229_v59  ;;  %v276_v20 = vsel %vm260_vm12, %v179_v15, %v255_v62  ;;  %v275_v21 = vsel %vm260_vm12, %v178_v63, %v254_v56  ;;  %v143_v29 = vsel %vm62_vm9, %v142_v9, %v1098_v2 }
 0x101   :  { %v154_v26 = vpop.permute.xlu1 %153  ;;  %326 = vmatprep.subr.mxu0 %v266_v19  ;;  %393 = vmatprep.subr.mxu1 %v276_v20  ;;  %v115_v22 = vpop.permute.xlu0 %114  ;;  %vm64_vm15 = vcmp.ge.s32.totalorder %v1125_v11, 1  ;;  %vm65_vm14 = vcmp.ge.s32.totalorder %v1131_v14, 1  ;;  %v216_v38 = vrot.slane %v143_v29, 4  ;;  %vm282_vm10 = vcmask 293888  }
 0x102   :  { %v158_v24 = vsel %vm122_vm13, %v154_v26, %v148_v36  ;;  %394 = vmatpush1.msra.mxu1 %v275_v21  ;;  %v140_v36 = vsel %vm122_vm13, %v1278_v53, %v1280_v54  ;;  %v230_v56 = vrot.slane %v1204_v33, 4 }
 0x103   :  { %395 = vmatprep.subr.mxu1 %v272_v52  ;;  %v159_v4 = vsel %vm62_vm9, %v158_v24, %v1226_v40  ;;  %v139_v40 = vsel %vm122_vm13, %v1280_v54, %v1282_v55  ;;  %v70_v54 = vld [vmem:[%s1818_s2] sm:$0xf]  ;;  %v145_v55 = vsel %vm64_vm15, %v140_v36, %v1093_v1 }
 0x104   :  { %396 = vmatpush1.msra.mxu1 %v271_v30  ;;  %v265_v31 = vsel %vm260_vm12, %v159_v4, %v228_v28 }
 0x105   :  { %v117_v2 = vpop.permute.xlu1 %116  ;;  %327 = vmatpush1.msra.mxu0 %v265_v31  ;;  %v121_v37 = vpop.permute.xlu0 %120 }
 0x106   :  { %v125_v41 = vsel %vm122_vm13, %v115_v22, %v117_v2  ;;  %v126_v43 = vsel %vm122_vm13, %v121_v37, %v115_v22 }
 0x107   :  { %v128_v53 = vsel %vm63_vm11, %v125_v41, %v1199_v32  ;;  %v127_v46 = vsel %vm62_vm9, %v126_v43, %v1221_v39  ;;  %v146_v32 = vsel %vm65_vm14, %v139_v40, %v1106_v3 }
 0x108   :  { %v262_v48 = vsel %vm260_vm12, %v128_v53, %v217_v35  ;;  %v261_v49 = vsel %vm260_vm12, %v127_v46, %v216_v38  ;;  %v219_v0 = vrot.slane %v146_v32, 4 }
 0x109   :  { %v119_v50 = vpop.permute.xlu1 %118  ;;  %328 = vmatprep.subr.mxu0 %v262_v48  ;;  %v152_v39 = vpop.permute.xlu0 %151 }
 0x10a   :  { %v123_v57 = vsel %vm122_vm13, %v119_v50, %v121_v37  ;;  %v124_v59 = vsel %vm122_vm13, %v117_v2, %v119_v50  ;;  %v155_v1 = vsel %vm122_vm13, %v152_v39, %v154_v26  ;;  %v156_v60 = vsel %vm122_vm13, %v150_v58, %v152_v39  ;;  %329 = vmatpush1.msra.mxu0 %v261_v49 }
 0x10b   :  { %1008 = vmatmul.mubr.msk.f32.vlgmr.msra.gmra.mxu0 %vm282_vm10, %v70_v54  ;;  %v162_v3 = vsel %vm65_vm14, %v155_v1, %v1238_v42  ;;  %v161_v61 = vsel %vm64_vm15, %v156_v60, %v1176_v25  ;;  %v130_v62 = vsel %vm65_vm14, %v123_v57, %v1250_v44  ;;  %v129_v7 = vsel %vm64_vm15, %v124_v59, %v1204_v33 }
 0x10c   :  { %v268_v6 = vsel %vm260_vm12, %v162_v3, %v231_v51  ;;  %v267_v58 = vsel %vm260_vm12, %v161_v61, %v230_v56  ;;  %776 = vmatprep.mubr.f32.mxu0 %v1055_v45  ;;  %v218_v42 = vrot.slane %v145_v55, 4  ;;  %v264_v25 = vsel %vm260_vm12, %v130_v62, %v219_v0 }
 0x10d   :  { %397 = vmatprep.subr.mxu1 %v268_v6  ;;  %v1057_v49 = vmov 1   ;;  %v1058_v59 = vmov 2  }
 0x10e   :  { %398 = vmatpush1.msra.mxu1 %v267_v58  ;;  %v263_v8 = vsel %vm260_vm12, %v129_v7, %v218_v42  ;;  %1033 = vset.pattern.permute.xlu0 %v1057_v49 }
 0x10f   :  { %399 = vmatprep.subr.mxu1 %v264_v25  ;;  %1034 = vset.pattern.permute.xlu1 %v1058_v59 }
 0x110   :  { %400 = vmatpush1.msra.mxu1 %v263_v8 }
 0x111   :  { %1011 = vmatmul.mubr.msk.f32.vlgmr.msra.gmra.mxu1 %vm282_vm10, %v70_v54 }
 0x112   :  { %847 = vmatprep.mubr.f32.mxu1 %v1055_v45 }
 0x116   :  { %v280_v44 = vpop.permute.xlu0 %279 }
 0x1cb   :  { %v364_v10 = vpop.f32.mrf.mxu0 }
 0x1cc   :  { %v365_v15 = vadd.f32 %v364_v10, %v280_v44 }
 0x1cd   :  { %v366_v63 = vpop.f32.mrf.mxu0 }
 0x1ce   :  { %v367_v33 = vadd.f32 %v366_v63, %v280_v44  ;;  %v440_v9 = vmax.f32 %v365_v15, 0.0 }
 0x1d0   :  { %v441_v19 = vmax.f32 %v367_v33, 0.0  ;;  %v453_v20 = vmul.f32 %v440_v9, %v440_v9  ;;  %v444_v22 = vsel %vm260_vm12, %v440_v9, 0.0 }
 0x1d1   :  { %v435_v21 = vpop.f32.mrf.mxu1 }
 0x1d2   :  { %v436_v26 = vadd.f32 %v435_v21, %v280_v44  ;;  %v445_v23 = vsel %vm260_vm12, %v441_v19, 0.0  ;;  %v454_v24 = vmul.f32 %v441_v19, %v441_v19  ;;  %v457_v45 = vsel %vm260_vm12, %v453_v20, 0.0 }
 0x1d3   :  { %v437_v52 = vpop.f32.mrf.mxu1  ;;  %v446_v4 = vadd.f32 %v445_v23, %v444_v22 }
 0x1d4   :  { %v442_v28 = vmax.f32 %v436_v26, 0.0  ;;  %v438_v29 = vadd.f32 %v437_v52, %v280_v44  ;;  %v458_v30 = vsel %vm260_vm12, %v454_v24, 0.0 }
 0x1d5   :  { %v459_v37 = vadd.f32 %v458_v30, %v457_v45 }
 0x1d6   :  { %v455_v31 = vmul.f32 %v442_v28, %v442_v28  ;;  %v443_v35 = vmax.f32 %v438_v29, 0.0  ;;  %v447_v36 = vsel %vm260_vm12, %v442_v28, 0.0 }
 0x1d7   :  { %v448_v2 = vadd.f32 %v447_v36, %v446_v4 }
 0x1d8   :  { %v449_v40 = vsel %vm260_vm12, %v443_v35, 0.0  ;;  %v456_v38 = vmul.f32 %v443_v35, %v443_v35  ;;  %v460_v41 = vsel %vm260_vm12, %v455_v31, 0.0 }
 0x1d9   :  { %v450_v43 = vadd.f32 %v449_v40, %v448_v2  ;;  %v461_v53 = vadd.f32 %v460_v41, %v459_v37  ;;  %v1059_v37 = vmov 3  }
 0x1da   :  { %v462_v46 = vsel %vm260_vm12, %v456_v38, 0.0 }
 0x1db   :  { %451 = vadd.xlane.f32.xlu1 %v450_v43  ;;  %v463_v48 = vadd.f32 %v462_v46, %v461_v53 }
 0x1dd   :  { %464 = vadd.xlane.f32.xlu0 %v463_v48 }
 0x264   :  { %v452_v54 = vpop.xlane.xlu1 %451 }
 0x265   :  { %v466_v55 = vmul.f32 0.001953125, %v452_v54 }
 0x266   :  { %v465_v32 = vpop.xlane.xlu0 %464 }
 0x267   :  { %v468_v50 = vmul.f32 %v466_v55, %v466_v55  ;;  %v467_v39 = vmul.f32 0.001953125, %v465_v32 }
 0x269   :  { %v469_v51 = vsub.f32 %v467_v39, %v468_v50 }
 0x26b   :  { %v470_v56 = vmax.f32 %v469_v51, 0.0 }
 0x26d   :  { %v471_v57 = vadd.f32 1e-05, %v470_v56 }
 0x26f   :  { %1043 = vrsqrt.f32 %v471_v57 }
 0x27c   :  { %v1044_v1 = vpop.eup %1043 }
 0x27d   :  { %v473_v60 = vmul.f32 %v1044_v1, %v1273_v47 }
 0x27f   :  { %476 = vperm.xlu0 %1033, %v473_v60   ;;  %v483_v3 = vmul.f32 %v473_v60, %v466_v55 }
 0x281   :  { %485 = vrot.lane.b32.xlu1 %v483_v3, %s1052_s20 }
 0x2f3   :  { %v486_v61 = vpop.permute.xlu1 %485 }
 0x2f4   :  { %v488_v62 = vsub.f32 %v1273_v47, %v486_v61 }
 0x2f6   :  { %491 = vperm.xlu1 %1034, %v488_v62  }
 0x2fa   :  { %v477_v0 = vpop.permute.xlu0 %476  ;;  %1035 = vset.pattern.permute.xlu1 %v1059_v37 }
 0x2fb   :  { %v480_v6 = vmul.f32 %v477_v0, %v441_v19  ;;  %v482_v58 = vmul.f32 %v477_v0, %v443_v35  ;;  %v481_v8 = vmul.f32 %v477_v0, %v442_v28  ;;  %v479_v47 = vmul.f32 %v477_v0, %v440_v9 }
 0x371   :  { %v492_v7 = vpop.permute.xlu1 %491 }
 0x372   :  { %v1472_v42 = vadd.f32 %v492_v7, %v480_v6  ;;  %v1474_v25 = vadd.f32 %v492_v7, %v482_v58  ;;  %v1480_v44 = vadd.f32 %v492_v7, %v481_v8  ;;  %v1490_v10 = vadd.f32 %v492_v7, %v479_v47 }
 0x374   :  { %506 = vrot.lane.b32.xlu0 %v1474_v25, %s1052_s20  ;;  %518 = vrot.lane.b32.xlu1 %v1472_v42, %s1051_s19 }
 0x378   :  { %600 = vrot.lane.b32.xlu0 %v1480_v44, %s1053_s23  ;;  %520 = vrot.lane.b32.xlu1 %v1480_v44, %s1051_s19 }
 0x37c   :  { %602 = vrot.lane.b32.xlu0 %v1474_v25, %s1053_s23  ;;  %522 = vrot.lane.b32.xlu1 %v1474_v25, %s1051_s19 }
 0x380   :  { %548 = vrot.lane.b32.xlu0 %v1490_v10, %s1054_s24  ;;  %500 = vrot.lane.b32.xlu1 %v1490_v10, %s1052_s20 }
 0x384   :  { %552 = vrot.lane.b32.xlu0 %v1480_v44, %s1054_s24  ;;  %502 = vrot.lane.b32.xlu1 %v1472_v42, %s1052_s20 }
 0x388   :  { %504 = vrot.lane.b32.xlu1 %v1480_v44, %s1052_s20 }
 0x38c   :  { %516 = vrot.lane.b32.xlu1 %v1490_v10, %s1051_s19 }
 0x390   :  { %598 = vrot.lane.b32.xlu1 %v1472_v42, %s1053_s23 }
 0x394   :  { %596 = vrot.lane.b32.xlu1 %v1490_v10, %s1053_s23 }
 0x398   :  { %550 = vrot.lane.b32.xlu1 %v1472_v42, %s1054_s24 }
 0x39c   :  { %554 = vrot.lane.b32.xlu1 %v1474_v25, %s1054_s24 }
 0x3e6   :  { %v519_v15 = vpop.permute.xlu1 %518  ;;  %v507_v29 = vpop.permute.xlu0 %506 }
 0x3ea   :  { %v521_v63 = vpop.permute.xlu1 %520  ;;  %v601_v40 = vpop.permute.xlu0 %600 }
 0x3eb   :  { %v525_v33 = vsel %vm105_vm0, %v519_v15, %v521_v63 }
 0x3ec   :  { %v1517_v9 = vsel %vm59_vm2, %v525_v33, %v1472_v42  ;;  %vm1828_vm2 = vcmp.le.s32.totalorder %v1127_v12, 14 }
 0x3ed   :  { %614 = vrot.lane.b32.xlu0 %v1517_v9, %s1053_s23  ;;  %v657_v0 = vrot.slane %v1517_v9, 4 }
 0x3ee   :  { %v523_v19 = vpop.permute.xlu1 %522  ;;  %v603_v41 = vpop.permute.xlu0 %602 }
 0x3ef   :  { %v524_v20 = vsel %vm105_vm0, %v521_v63, %v523_v19 }
 0x3f0   :  { %v1526_v21 = vsel %vm60_vm1, %v524_v20, %v1480_v44  ;;  %vm1827_vm1 = vcmp.lt.s32.totalorder %v1160_v16, 112 }
 0x3f1   :  { %616 = vrot.lane.b32.xlu1 %v1526_v21, %s1053_s23 }
 0x3f2   :  { %v501_v26 = vpop.permute.xlu1 %500  ;;  %v1606_v53 = vpop.permute.xlu0 %548 }
 0x3f3   :  { %v511_v30 = vsel %vm88_vm3, %v507_v29, %v501_v26 }
 0x3f4   :  { %v1555_v31 = vsel %vm54_vm6, %v511_v30, %v1490_v10  ;;  %vm1832_vm6 = vmmov %vm1828_vm2  ;;  %v685_v30 = vsel %vm260_vm12, %v1472_v42, %v657_v0 }
 0x3f6   :  { %v503_v22 = vpop.permute.xlu1 %502  ;;  %v1610_v48 = vpop.permute.xlu0 %552 }
 0x3f7   :  { %v510_v23 = vsel %vm88_vm3, %v501_v26, %v503_v22 }
 0x3f8   :  { %v1535_v24 = vsel %vm55_vm4, %v510_v23, %v1472_v42  ;;  %vm1830_vm4 = vmmov %vm1827_vm1 }
 0x3f9   :  { %582 = vrot.lane.b32.xlu0 %v1535_v24, %s1053_s23 }
 0x3fa   :  { %v505_v52 = vpop.permute.xlu1 %504 }
 0x3fb   :  { %v509_v28 = vsel %vm88_vm3, %v503_v22, %v505_v52  ;;  %v508_v2 = vsel %vm88_vm3, %v505_v52, %v507_v29  ;;  %vm1829_vm3 = vmmov %vm1827_vm1 }
 0x3fc   :  { %v1544_v45 = vsel %vm56_vm5, %v509_v28, %v1480_v44  ;;  %vm1831_vm5 = vmmov %vm1827_vm1 }
 0x3fd   :  { %584 = vrot.lane.b32.xlu1 %v1544_v45, %s1053_s23 }
 0x3fe   :  { %v517_v18 = vpop.permute.xlu1 %516 }
 0x3ff   :  { %v526_v4 = vsel %vm105_vm0, %v517_v18, %v519_v15  ;;  %v527_v35 = vsel %vm105_vm0, %v523_v19, %v517_v18  ;;  %vm1826_vm0 = vcmp.ge.s32.totalorder %v1210_v34, 1  ;;  %v1603_v34 = vld [vmem:[%s1817_s3] sm:$0xf] }
 0x400   :  { %v1560_v17 = vsel %vm58_vm7, %v526_v4, %v1490_v10  ;;  %v1571_v36 = vsel %vm61_vm8, %v527_v35, %v1474_v25  ;;  %v1582_v27 = vsel %vm1826_vm0, %v508_v2, %v1474_v25  ;;  %vm1833_vm7 = vcmp.le.s32.totalorder %v1129_v13, 14  ;;  %vm1834_vm8 = vmmov %vm1828_vm2 }
 0x401   :  { %580 = vrot.lane.b32.xlu1 %v1555_v31, %s1053_s23  ;;  %612 = vrot.lane.b32.xlu0 %v1560_v17, %s1053_s23  ;;  %vm1835_vm0 = vmmov %vm1827_vm1  ;;  %v656_v33 = vrot.slane %v1560_v17, 4 }
 0x402   :  { %v599_v38 = vpop.permute.xlu1 %598 }
 0x403   :  { %v605_v39 = vsel %vm1829_vm3, %v599_v38, %v601_v40  ;;  %vm1838_vm3 = vmmov %vm1833_vm7  ;;  %v684_v35 = vsel %vm260_vm12, %v1490_v10, %v656_v33 }
 0x404   :  { %v609_v1 = vsel %vm1832_vm6, %v605_v39, %v1472_v42  ;;  %vm1841_vm6 = vcmp.le.s32.totalorder %v1125_v11, 14 }
 0x405   :  { %618 = vrot.lane.b32.xlu1 %v1571_v36, %s1053_s23  ;;  %564 = vrot.lane.b32.xlu0 %v1560_v17, %s1054_s24  ;;  %v669_v6 = vrot.slane %v609_v1, 4 }
 0x406   :  { %v597_v43 = vpop.permute.xlu1 %596 }
 0x407   :  { %v606_v51 = vsel %vm1830_vm4, %v597_v43, %v599_v38  ;;  %vm1839_vm4 = vmmov %vm1838_vm3 }
 0x408   :  { %v608_v60 = vsel %vm1833_vm7, %v606_v51, %v1490_v10  ;;  %vm1842_vm7 = vmmov %vm1835_vm0 }
 0x409   :  { %566 = vrot.lane.b32.xlu1 %v1517_v9, %s1054_s24  ;;  %586 = vrot.lane.b32.xlu0 %v1582_v27, %s1053_s23  ;;  %v668_v58 = vrot.slane %v608_v60, 4 }
 0x40a   :  { %v1608_v46 = vpop.permute.xlu1 %550 }
 0x40b   :  { %v558_v51 = vsel %vm122_vm13, %v1606_v53, %v1608_v46 }
 0x40d   :  { %532 = vrot.lane.b32.xlu1 %v1555_v31, %s1054_s24  ;;  %570 = vrot.lane.b32.xlu0 %v1571_v36, %s1054_s24 }
 0x40e   :  { %v1612_v49 = vpop.permute.xlu1 %554 }
 0x40f   :  { %v559_v1 = vsel %vm122_vm13, %v1612_v49, %v1606_v53 }
 0x411   :  { %538 = vrot.lane.b32.xlu1 %v1582_v27, %s1054_s24  ;;  %534 = vrot.lane.b32.xlu0 %v1535_v24, %s1054_s24 }
 0x415   :  { %568 = vrot.lane.b32.xlu1 %v1526_v21, %s1054_s24  ;;  %536 = vrot.lane.b32.xlu0 %v1544_v45, %s1054_s24 }
 0x419   :  { %694 = vperm.xlu1 %1035, %v1603_v34  }
 0x45f   :  { %v615_v54 = vpop.permute.xlu0 %614 }
 0x463   :  { %v617_v55 = vpop.permute.xlu1 %616 }
 0x464   :  { %v621_v32 = vsel %vm1827_vm1, %v615_v54, %v617_v55  ;;  %vm1836_vm1 = vmmov %vm1835_vm0 }
 0x465   :  { %v625_v50 = vsel %vm1828_vm2, %v621_v32, %v1517_v9  ;;  %vm1837_vm2 = vmmov %vm1835_vm0 }
 0x466   :  { %1012 = vmatprep.subr.msk.mxu0 %vm260_vm12, %v625_v50  ;;  %v604_v47 = vsel %vm1837_vm2, %v601_v40, %v603_v41 }
 0x467   :  { %v610_v52 = vsel %vm1841_vm6, %v604_v47, %v1480_v44 }
 0x468   :  { %v670_v37 = vrot.slane %v610_v52, 4 }
 0x46b   :  { %v583_v56 = vpop.permute.xlu0 %582 }
 0x46f   :  { %v585_v57 = vpop.permute.xlu1 %584 }
 0x470   :  { %v589_v59 = vsel %vm1831_vm5, %v583_v56, %v585_v57  ;;  %vm1840_vm5 = vmmov %vm1835_vm0 }
 0x471   :  { %v593_v62 = vsel %vm1834_vm8, %v589_v59, %v1535_v24  ;;  %v607_v19 = vsel %vm1840_vm5, %v603_v41, %v597_v43  ;;  %vm1843_vm8 = vmmov %vm1835_vm0  ;;  %v645_v41 = vrot.slane %v1535_v24, 4  ;;  %v659_v43 = vrot.slane %v1571_v36, 4 }
 0x472   :  { %v689_v20 = vsel %vm260_vm12, %v593_v62, %v669_v6 }
 0x473   :  { %v613_v3 = vpop.permute.xlu0 %612  ;;  %v581_v61 = vpop.permute.xlu1 %580  ;;  %v687_v53 = vsel %vm260_vm12, %v1474_v25, %v659_v43 }
 0x474   :  { %v622_v7 = vsel %vm1835_vm0, %v613_v3, %v615_v54  ;;  %v590_v8 = vsel %vm1836_vm1, %v581_v61, %v583_v56  ;;  %vm1844_vm0 = vcmp.le.s32.totalorder %v1131_v14, 14  ;;  %vm1845_vm1 = vmmov %vm1841_vm6  ;;  %v658_v54 = vrot.slane %v1526_v21, 4 }
 0x475   :  { %v624_v15 = vsel %vm1838_vm3, %v622_v7, %v1560_v17  ;;  %v592_v63 = vsel %vm1839_vm4, %v590_v8, %v1555_v31  ;;  %v611_v18 = vsel %vm1844_vm0, %v607_v19, %v1474_v25  ;;  %vm1846_vm2 = vmmov %vm1844_vm0  ;;  %v560_v7 = vsel %vm62_vm9, %v559_v1, %v1490_v10 }
 0x476   :  { %1013 = vmatpush1.msk.msra.mxu0 %vm260_vm12, %v624_v15  ;;  %v688_v26 = vsel %vm260_vm12, %v592_v63, %v668_v58  ;;  %vm1847_vm3 = vmmov %vm1840_vm5  ;;  %v644_v58 = vrot.slane %v1555_v31, 4  ;;  %v557_v15 = vsel %vm122_vm13, %v1608_v46, %v1610_v48  ;;  %v632_v19 = vrot.slane %v560_v7, 4 }
 0x477   :  { %v565_v22 = vpop.permute.xlu0 %564  ;;  %736 = vmatprep.subr.mxu0 %v689_v20  ;;  %v619_v23 = vpop.permute.xlu1 %618  ;;  %vm1848_vm4 = vmmov %vm1847_vm3  ;;  %v562_v52 = vsel %vm64_vm15, %v557_v15, %v1480_v44 }
 0x478   :  { %v620_v28 = vsel %vm1842_vm7, %v617_v55, %v619_v23  ;;  %v623_v29 = vsel %vm1843_vm8, %v619_v23, %v613_v3  ;;  %737 = vmatpush1.msra.mxu0 %v688_v26  ;;  %v671_v55 = vrot.slane %v611_v18, 4  ;;  %vm1849_vm5 = vmmov %vm1845_vm1  ;;  %v498_v23 = vld [vmem:[%s1818_s2 + $0x4] sm:$0xf] }
 0x479   :  { %v626_v4 = vsel %vm1845_vm1, %v620_v28, %v1526_v21  ;;  %738 = vmatprep.subr.mxu0 %v685_v30  ;;  %v627_v2 = vsel %vm1846_vm2, %v623_v29, %v1571_v36  ;;  %vm1850_vm6 = vmmov %vm1844_vm0  ;;  %v646_v28 = vrot.slane %v1544_v45, 4 }
 0x47a   :  { %739 = vmatpush1.msra.mxu0 %v684_v35  ;;  %1015 = vmatprep.subr.msk.mxu1 %vm260_vm12, %v627_v2 }
 0x47b   :  { %v587_v40 = vpop.permute.xlu0 %586  ;;  %1016 = vmatpush1.msk.msra.mxu1 %vm260_vm12, %v626_v4  ;;  %v567_v38 = vpop.permute.xlu1 %566 }
 0x47c   :  { %v588_v32 = vsel %vm1847_vm3, %v585_v57, %v587_v40  ;;  %v591_v50 = vsel %vm1848_vm4, %v587_v40, %v581_v61  ;;  %v574_v39 = vsel %vm122_vm13, %v565_v22, %v567_v38 }
 0x47d   :  { %v594_v56 = vsel %vm1849_vm5, %v588_v32, %v1544_v45  ;;  %v577_v59 = vsel %vm63_vm11, %v574_v39, %v1517_v9  ;;  %v595_v57 = vsel %vm1850_vm6, %v591_v50, %v1582_v27  ;;  %v561_v9 = vsel %vm63_vm11, %v558_v51, %v1472_v42 }
 0x47e   :  { %v681_v60 = vsel %vm260_vm12, %v577_v59, %v645_v41  ;;  %v691_v3 = vsel %vm260_vm12, %v595_v57, %v671_v55  ;;  %v690_v61 = vsel %vm260_vm12, %v594_v56, %v670_v37  ;;  %v686_v42 = vsel %vm260_vm12, %v1480_v44, %v658_v54 }
 0x47f   :  { %v571_v62 = vpop.permute.xlu0 %570  ;;  %740 = vmatprep.subr.mxu0 %v681_v60  ;;  %807 = vmatprep.subr.mxu1 %v691_v3  ;;  %v533_v0 = vpop.permute.xlu1 %532  ;;  %v633_v63 = vrot.slane %v561_v9, 4 }
 0x480   :  { %v575_v6 = vsel %vm122_vm13, %v571_v62, %v565_v22  ;;  %808 = vmatpush1.msra.mxu1 %v690_v61 }
 0x481   :  { %v576_v8 = vsel %vm62_vm9, %v575_v6, %v1560_v17  ;;  %809 = vmatprep.subr.mxu1 %v687_v53  ;;  %v556_v17 = vsel %vm122_vm13, %v1610_v48, %v1612_v49 }
 0x482   :  { %810 = vmatpush1.msra.mxu1 %v686_v42  ;;  %v680_v47 = vsel %vm260_vm12, %v576_v8, %v644_v58  ;;  %v563_v13 = vsel %vm65_vm14, %v556_v17, %v1474_v25 }
 0x483   :  { %v535_v33 = vpop.permute.xlu0 %534  ;;  %741 = vmatpush1.msra.mxu0 %v680_v47  ;;  %v539_v10 = vpop.permute.xlu1 %538  ;;  %v635_v2 = vrot.slane %v563_v13, 4 }
 0x484   :  { %v542_v20 = vsel %vm122_vm13, %v533_v0, %v535_v33  ;;  %v543_v26 = vsel %vm122_vm13, %v539_v10, %v533_v0 }
 0x485   :  { %v544_v46 = vsel %vm62_vm9, %v543_v26, %v1555_v31  ;;  %v545_v22 = vsel %vm63_vm11, %v542_v20, %v1535_v24  ;;  %v647_v24 = vrot.slane %v1582_v27, 4 }
 0x486   :  { %v677_v48 = vsel %vm260_vm12, %v545_v22, %v633_v63  ;;  %v676_v49 = vsel %vm260_vm12, %v544_v46, %v632_v19 }
 0x487   :  { %v537_v31 = vpop.permute.xlu0 %536  ;;  %742 = vmatprep.subr.mxu0 %v677_v48  ;;  %v569_v12 = vpop.permute.xlu1 %568  ;;  %v1061_v48 = vmov 5  }
 0x488   :  { %v540_v29 = vsel %vm122_vm13, %v537_v31, %v539_v10  ;;  %v541_v30 = vsel %vm122_vm13, %v535_v33, %v537_v31  ;;  %v572_v44 = vsel %vm122_vm13, %v569_v12, %v571_v62  ;;  %v573_v18 = vsel %vm122_vm13, %v567_v38, %v569_v12  ;;  %743 = vmatpush1.msra.mxu0 %v676_v49 }
 0x489   :  { %v578_v25 = vsel %vm64_vm15, %v573_v18, %v1526_v21  ;;  %1014 = vmatmul.mubr.msk.f32.vlgmr.msra.gmra.mxu0 %vm282_vm10, %v498_v23  ;;  %v579_v4 = vsel %vm65_vm14, %v572_v44, %v1571_v36  ;;  %v547_v35 = vsel %vm65_vm14, %v540_v29, %v1582_v27  ;;  %v546_v16 = vsel %vm64_vm15, %v541_v30, %v1544_v45 }
 0x48a   :  { %v683_v37 = vsel %vm260_vm12, %v579_v4, %v647_v24  ;;  %v682_v40 = vsel %vm260_vm12, %v578_v25, %v646_v28  ;;  %v634_v21 = vrot.slane %v562_v52, 4  ;;  %v679_v38 = vsel %vm260_vm12, %v547_v35, %v635_v2  ;;  %1037 = vset.pattern.permute.xlu0 %v1061_v48 }
 0x48b   :  { %811 = vmatprep.subr.mxu1 %v683_v37  ;;  %v1060_v33 = vmov 4  }
 0x48c   :  { %812 = vmatpush1.msra.mxu1 %v682_v40  ;;  %v678_v36 = vsel %vm260_vm12, %v546_v16, %v634_v21  ;;  %1036 = vset.pattern.permute.xlu1 %v1060_v33  ;;  %v1049_v40 = vld [vmem:[%s1815_s0] sm:$0xff] }
 0x48d   :  { %813 = vmatprep.subr.mxu1 %v679_v38  ;;  %v924_v33 = vld [vmem:[%s1817_s3] sm:$0xf] }
 0x48e   :  { %814 = vmatpush1.msra.mxu1 %v678_v36 }
 0x48f   :  { %1017 = vmatmul.mubr.msk.f32.vlgmr.msra.gmra.mxu1 %vm282_vm10, %v498_v23 }
 0x494   :  { %v695_v14 = vpop.permute.xlu1 %694 }
 0x549   :  { %v778_v27 = vpop.f32.mrf.mxu0 }
 0x54a   :  { %v779_v41 = vadd.f32 %v778_v27, %v695_v14 }
 0x54b   :  { %v780_v11 = vpop.f32.mrf.mxu0 }
 0x54c   :  { %v781_v45 = vadd.f32 %v780_v11, %v695_v14  ;;  %v854_v43 = vmax.f32 %v779_v41, 0.0 }
 0x54e   :  { %v855_v54 = vmax.f32 %v781_v45, 0.0  ;;  %v867_v55 = vmul.f32 %v854_v43, %v854_v43  ;;  %v858_v39 = vsel %vm260_vm12, %v854_v43, 0.0 }
 0x54f   :  { %v849_v32 = vpop.f32.mrf.mxu1 }
 0x550   :  { %v850_v50 = vadd.f32 %v849_v32, %v695_v14  ;;  %v859_v51 = vsel %vm260_vm12, %v855_v54, 0.0  ;;  %v868_v56 = vmul.f32 %v855_v54, %v855_v54  ;;  %v871_v60 = vsel %vm260_vm12, %v867_v55, 0.0 }
 0x551   :  { %v851_v59 = vpop.f32.mrf.mxu1  ;;  %v860_v61 = vadd.f32 %v859_v51, %v858_v39 }
 0x552   :  { %v856_v57 = vmax.f32 %v850_v50, 0.0  ;;  %v852_v1 = vadd.f32 %v851_v59, %v695_v14  ;;  %v872_v3 = vsel %vm260_vm12, %v868_v56, 0.0 }
 0x553   :  { %v873_v53 = vadd.f32 %v872_v3, %v871_v60 }
 0x554   :  { %v869_v62 = vmul.f32 %v856_v57, %v856_v57  ;;  %v857_v0 = vmax.f32 %v852_v1, 0.0  ;;  %v861_v9 = vsel %vm260_vm12, %v856_v57, 0.0 }
 0x555   :  { %v862_v6 = vadd.f32 %v861_v9, %v860_v61  ;;  %v1062_v9 = vmov 6  }
 0x556   :  { %v863_v58 = vsel %vm260_vm12, %v857_v0, 0.0  ;;  %v870_v7 = vmul.f32 %v857_v0, %v857_v0  ;;  %v874_v8 = vsel %vm260_vm12, %v869_v62, 0.0 }
 0x557   :  { %v864_v42 = vadd.f32 %v863_v58, %v862_v6  ;;  %v875_v47 = vadd.f32 %v874_v8, %v873_v53 }
 0x558   :  { %v876_v15 = vsel %vm260_vm12, %v870_v7, 0.0 }
 0x559   :  { %865 = vadd.xlane.f32.xlu0 %v864_v42  ;;  %v877_v63 = vadd.f32 %v876_v15, %v875_v47 }
 0x55b   :  { %878 = vadd.xlane.f32.xlu1 %v877_v63  ;;  %v1063_v63 = vmov 7  }
 0x5e2   :  { %v866_v10 = vpop.xlane.xlu0 %865 }
 0x5e3   :  { %v880_v17 = vmul.f32 0.001953125, %v866_v10 }
 0x5e4   :  { %v879_v19 = vpop.xlane.xlu1 %878 }
 0x5e5   :  { %v882_v20 = vmul.f32 %v880_v17, %v880_v17  ;;  %v881_v26 = vmul.f32 0.001953125, %v879_v19 }
 0x5e7   :  { %v883_v46 = vsub.f32 %v881_v26, %v882_v20 }
 0x5e9   :  { %v884_v22 = vmax.f32 %v883_v46, 0.0  ;;  %v1064_v46 = vmov 839922192  }
 0x5eb   :  { %v885_v23 = vadd.f32 1e-05, %v884_v22  ;;  %v970_v22 = vunpack.c.l.s4 %v1064_v46 }
 0x5ed   :  { %1045 = vrsqrt.f32 %v885_v23  ;;  %v971_v23 = vunpack.c.0.s8 %v970_v22 }
 0x5ef   :  { %v974_v48 = vsub.s32 %v971_v23, %v1112_v5 }
 0x5fa   :  { %v1046_v49 = vpop.eup %1045 }
 0x5fb   :  { %v887_v52 = vmul.f32 %v1046_v49, %v1603_v34 }
 0x5fd   :  { %890 = vperm.xlu1 %1036, %v887_v52   ;;  %v897_v13 = vmul.f32 %v887_v52, %v880_v17 }
 0x5ff   :  { %899 = vrot.lane.b32.xlu0 %v897_v13, %s1052_s20 }
 0x601   :  { %1039 = vset.pattern.permute.xlu1 %v1063_v63 }
 0x671   :  { %v900_v31 = vpop.permute.xlu0 %899 }
 0x672   :  { %v902_v12 = vsub.f32 %v1603_v34, %v900_v31  ;;  %v1050_v34 = vld [vmem:[%s1815_s0 + $0x8] sm:$0xff] }
 0x674   :  { %905 = vperm.xlu0 %1037, %v902_v12  }
 0x678   :  { %v891_v24 = vpop.permute.xlu1 %890  ;;  %1038 = vset.pattern.permute.xlu0 %v1062_v9 }
 0x679   :  { %v893_v28 = vmul.f32 %v891_v24, %v854_v43  ;;  %v894_v29 = vmul.f32 %v891_v24, %v855_v54  ;;  %v895_v30 = vmul.f32 %v891_v24, %v856_v57  ;;  %v896_v44 = vmul.f32 %v891_v24, %v857_v0 }
 0x6ef   :  { %v906_v18 = vpop.permute.xlu0 %905 }
 0x6f0   :  { %v908_v25 = vadd.f32 %v906_v18, %v893_v28  ;;  %v909_v4 = vadd.f32 %v906_v18, %v894_v29  ;;  %v910_v35 = vadd.f32 %v906_v18, %v895_v30  ;;  %v911_v2 = vadd.f32 %v906_v18, %v896_v44 }
 0x6f2   :  { %v916_v16 = vcombine.low %v908_v25, %v909_v4  ;;  %v917_v37 = vcombine.low %v910_v35, %v911_v2 }
 0x6f4   :  { %v920_v21 = vadd.f32 %v1049_v40, %v916_v16  ;;  %v921_v38 = vadd.f32 %v1050_v34, %v917_v37 }
 0x6f6   :  { %v922_v36 = vmax.f32 %v920_v21, 0.0  ;;  %v923_v14 = vmax.f32 %v921_v38, 0.0 }
 0x6f8   :  { %v927_v27 = vcombine.high %v922_v36, %v922_v36  ;;  %v940_v41 = vmul.f32 %v922_v36, %v922_v36  ;;  %v941_v11 = vmul.f32 %v923_v14, %v923_v14  ;;  %v928_v45 = vcombine.high %v923_v14, %v923_v14 }
 0x6f9   :  { %v931_v43 = vsel %vm260_vm12, %v922_v36, 0.0  ;;  %v934_v50 = vsel %vm260_vm12, %v923_v14, 0.0 }
 0x6fa   :  { %v932_v54 = vsel %vm260_vm12, %v927_v27, 0.0  ;;  %v944_v32 = vcombine.high %v940_v41, %v940_v41  ;;  %v945_v51 = vcombine.high %v941_v11, %v941_v11  ;;  %v948_v56 = vsel %vm260_vm12, %v940_v41, 0.0 }
 0x6fb   :  { %v933_v55 = vadd.f32 %v932_v54, %v931_v43  ;;  %v936_v57 = vsel %vm260_vm12, %v928_v45, 0.0  ;;  %v951_v3 = vsel %vm260_vm12, %v941_v11, 0.0 }
 0x6fc   :  { %v949_v59 = vsel %vm260_vm12, %v944_v32, 0.0  ;;  %v953_v62 = vsel %vm260_vm12, %v945_v51, 0.0 }
 0x6fd   :  { %v935_v39 = vadd.f32 %v934_v50, %v933_v55  ;;  %v950_v1 = vadd.f32 %v949_v59, %v948_v56 }
 0x6ff   :  { %v937_v60 = vadd.f32 %v936_v57, %v935_v39  ;;  %v952_v61 = vadd.f32 %v951_v3, %v950_v1 }
 0x701   :  { %938 = vadd.xlane.f32.xlu1 %v937_v60  ;;  %v954_v0 = vadd.f32 %v953_v62, %v952_v61 }
 0x703   :  { %955 = vadd.xlane.f32.xlu0 %v954_v0 }
 0x78a   :  { %v939_v6 = vpop.xlane.xlu1 %938 }
 0x78b   :  { %v957_v53 = vmul.f32 0.001953125, %v939_v6 }
 0x78c   :  { %v956_v7 = vpop.xlane.xlu0 %955 }
 0x78d   :  { %v959_v58 = vmul.f32 %v957_v53, %v957_v53  ;;  %v958_v8 = vmul.f32 0.001953125, %v956_v7 }
 0x78f   :  { %v960_v42 = vsub.f32 %v958_v8, %v959_v58 }
 0x791   :  { %v961_v47 = vmax.f32 %v960_v42, 0.0 }
 0x793   :  { %v962_v15 = vadd.f32 1e-05, %v961_v47 }
 0x795   :  { %1047 = vrsqrt.f32 %v962_v15 }
 0x7a2   :  { %v1048_v10 = vpop.eup %1047 }
 0x7a3   :  { %v964_v17 = vmul.f32 %v1048_v10, %v924_v33 }
 0x7a5   :  { %967 = vperm.xlu0 %1038, %v964_v17   ;;  %v979_v19 = vmul.f32 %v964_v17, %v957_v53 }
 0x7a7   :  { %981 = vrot.lane.b32.xlu1 %v979_v19, %s1052_s20 }
 0x7a9   :  { %1040 = vset.pattern.permute.xlu0 %v1063_v63 }
 0x819   :  { %v982_v20 = vpop.permute.xlu1 %981 }
 0x81a   :  { %v984_v26 = vsub.f32 %v924_v33, %v982_v20 }
 0x81c   :  { %987 = vperm.xlu1 %1039, %v984_v26  }
 0x820   :  { %v968_v49 = vpop.permute.xlu0 %967 }
 0x821   :  { %v975_v52 = vrot.slane %v968_v49, %v974_v48 }
 0x823   :  { %v977_v31 = vmul.f32 %v975_v52, %v922_v36  ;;  %v978_v12 = vmul.f32 %v975_v52, %v923_v14 }
 0x897   :  { %v988_v13 = vpop.permute.xlu1 %987 }
 0x898   :  { %v995_v24 = vrot.slane %v988_v13, %v974_v48 }
 0x89a   :  { %v997_v28 = vadd.f32 %v995_v24, %v977_v31  ;;  %v998_v29 = vadd.f32 %v995_v24, %v978_v12 }
 0x89c   :  { %999 = vst [vmem:[%s1819_s4] sm:$0xff] %v997_v28  ;;  %1000 = vst [vmem:[%s1819_s4 + $0x8] sm:$0xff] %v998_v29 }

</bundles_post_ra>
